<compile_context>
chip_gen: v6e
topology: v6e:2x2x1
jax: 0.10.0
libtpu: 0.0.40
codegen_flags: <defaults>
</compile_context>

<pallas_src>
import jax
import jax.numpy as jnp
from jax.experimental import pallas as pl
from jax.experimental.pallas import tpu as pltpu

# ---- model hyperparameters (small, consistent with the module) -------------
B = 2            # batch
N = 8            # sequence length (tokens)
DIM = 32         # embedding dim
HEADS = 4
DIM_HEAD = 16
INNER = HEADS * DIM_HEAD       # 64
BN = B * N                     # 16 tokens total
HBN = HEADS * BN               # 64 (head, token) rows after folding
SCALE = DIM_HEAD ** -0.5
LN_EPS = 1e-5                  # torch.nn.LayerNorm default
NEG_BIG = -1e9                 # additive mask value (exp underflows to exactly 0)


def attention_kernel(x_ref, gamma_ref, beta_ref, wqkv_ref, wout_ref, bout_ref,
                     mask_ref, o_ref):
    # x_ref: (BN, DIM) -- all batches' tokens, flattened.
    x = x_ref[...]

    # ---- LayerNorm over the channel dim -------------------------------------
    mu = jnp.mean(x, axis=-1, keepdims=True)
    var = jnp.mean((x - mu) ** 2, axis=-1, keepdims=True)
    xn = (x - mu) * jax.lax.rsqrt(var + LN_EPS)
    xn = xn * gamma_ref[...] + beta_ref[...]                      # (BN, DIM)

    # ---- QKV projection, batched over (q/k/v, head) -------------------------
    # One batched dot_general; heads come out on a leading axis, no lane
    # slicing of a wide (BN, 3*INNER) matrix needed.
    xn_b = jnp.broadcast_to(xn, (3 * HEADS, BN, DIM))             # (3H, BN, DIM)
    qkv = jnp.einsum('gnc,gcd->gnd', xn_b, wqkv_ref[...],
                     preferred_element_type=jnp.float32)          # (3H, BN, Dh)

    # ---- fold heads into the row (sublane) axis: layout no-op reshapes ------
    q = qkv[0:HEADS].reshape(HBN, DIM_HEAD)                       # (64, 16)
    k = qkv[HEADS:2 * HEADS].reshape(HBN, DIM_HEAD)
    v = qkv[2 * HEADS:3 * HEADS].reshape(HBN, DIM_HEAD)

    # ---- scores for ALL heads and batches in one MXU matmul -----------------
    # Cross-head / cross-batch entries are computed but masked to -1e9, so
    # exp() sends them to exactly 0 and they contribute nothing downstream.
    dots = jnp.einsum('nd,md->nm', q, k,
                      preferred_element_type=jnp.float32) * SCALE  # (64, 64)
    dots = dots + mask_ref[...]

    # ---- softmax(dim=-1) -----------------------------------------------------
    m = jnp.max(dots, axis=-1, keepdims=True)
    e = jnp.exp(dots - m)
    attn = e * pl.reciprocal(jnp.sum(e, axis=-1, keepdims=True))  # exact recip

    # ---- attention-weighted values: one more MXU matmul ----------------------
    ao = jnp.dot(attn, v, preferred_element_type=jnp.float32)     # (64, 16)

    # ---- output projection with the head-concat folded in --------------------
    ao_h = ao.reshape(HEADS, BN, DIM_HEAD)                        # (H, BN, Dh)
    proj = jnp.einsum('hnd,hdc->hnc', ao_h, wout_ref[...],
                      preferred_element_type=jnp.float32)         # (H, BN, DIM)
    out = jnp.sum(proj, axis=0) + bout_ref[...]                   # (BN, DIM)

    o_ref[...] = out.astype(o_ref.dtype)


def attention_forward(x, gamma, beta, w_qkv, w_out, b_out):
    # Host-side (pure layout, no arithmetic) parameter rearrangement:
    #   w_qkv: (DIM, 3*INNER), columns ordered (qkv, head, d)
    #          -> (3*HEADS, DIM, DIM_HEAD) so q/k/v/head is a batch axis.
    #   w_out: (INNER, DIM) -> (HEADS, DIM_HEAD, DIM).
    w_qkv_h = (w_qkv.reshape(DIM, 3, HEADS, DIM_HEAD)
               .transpose(1, 2, 0, 3)
               .reshape(3 * HEADS, DIM, DIM_HEAD))
    w_out_h = w_out.reshape(HEADS, DIM_HEAD, DIM)
    x_flat = x.reshape(BN, DIM)

    # Additive mask over the folded (head, token) x (head, token) score matrix:
    # row r = h*BN + n attends to col c = h'*BN + m only when the heads match
    # AND both tokens belong to the same batch element.
    r = jnp.arange(HBN, dtype=jnp.int32)
    r_head = r // BN
    r_batch = (r % BN) // N
    same = (r_head[:, None] == r_head[None, :]) & \
           (r_batch[:, None] == r_batch[None, :])
    mask = jnp.where(same, 0.0, NEG_BIG).astype(jnp.float32)      # (64, 64)

    out_flat = pl.pallas_call(
        attention_kernel,
        out_shape=jax.ShapeDtypeStruct((BN, DIM), jnp.float32),
        grid_spec=pltpu.PrefetchScalarGridSpec(
            num_scalar_prefetch=0,
            grid=(1,),                                  # collapsed: one step total
            in_specs=[
                pl.BlockSpec((BN, DIM), lambda i: (0, 0)),                      # x
                pl.BlockSpec((1, DIM), lambda i: (0, 0)),                       # gamma
                pl.BlockSpec((1, DIM), lambda i: (0, 0)),                       # beta
                pl.BlockSpec((3 * HEADS, DIM, DIM_HEAD), lambda i: (0, 0, 0)),  # W_qkv
                pl.BlockSpec((HEADS, DIM_HEAD, DIM), lambda i: (0, 0, 0)),      # W_out
                pl.BlockSpec((1, DIM), lambda i: (0, 0)),                       # b_out
                pl.BlockSpec((HBN, HBN), lambda i: (0, 0)),                     # mask
            ],
            out_specs=pl.BlockSpec((BN, DIM), lambda i: (0, 0)),
        ),
        compiler_params=pltpu.CompilerParams(
            dimension_semantics=("arbitrary",)),   # single step: no cross-TC sharding
    )(x_flat, gamma, beta, w_qkv_h, w_out_h, b_out, mask)

    return out_flat.reshape(B, N, DIM)


def reference_forward(x, gamma, beta, w_qkv, w_out, b_out):
    mu = jnp.mean(x, axis=-1, keepdims=True)
    var = jnp.mean((x - mu) ** 2, axis=-1, keepdims=True)
    xn = (x - mu) / jnp.sqrt(var + LN_EPS) * gamma[0] + beta[0]
    qkv = xn @ w_qkv                                        # (B, N, 3*INNER)
    q, k, v = jnp.split(qkv, 3, axis=-1)

    def split_heads(t):  # b n (h d) -> b h n d
        return t.reshape(B, N, HEADS, DIM_HEAD).transpose(0, 2, 1, 3)

    q, k, v = map(split_heads, (q, k, v))
    dots = jnp.einsum('bhnd,bhmd->bhnm', q, k) * SCALE
    attn = jax.nn.softmax(dots, axis=-1)
    out = jnp.einsum('bhnm,bhmd->bhnd', attn, v)
    out = out.transpose(0, 2, 1, 3).reshape(B, N, INNER)
    return out @ w_out + b_out[0]


if __name__ == "__main__":
    key = jax.random.PRNGKey(0)
    kx, kg, kb, kq, kw, kbo = jax.random.split(key, 6)

    x = jax.random.normal(kx, (B, N, DIM), dtype=jnp.float32)
    # deterministic synthetic parameters (shapes from the module __init__)
    gamma = jnp.ones((1, DIM), dtype=jnp.float32) \
        + 0.01 * jax.random.normal(kg, (1, DIM), dtype=jnp.float32)
    beta = 0.01 * jax.random.normal(kb, (1, DIM), dtype=jnp.float32)
    w_qkv = 0.1 * jax.random.normal(kq, (DIM, 3 * INNER), dtype=jnp.float32)
    w_out = 0.1 * jax.random.normal(kw, (INNER, DIM), dtype=jnp.float32)
    b_out = 0.01 * jax.random.normal(kbo, (1, DIM), dtype=jnp.float32)

    out = attention_forward(x, gamma, beta, w_qkv, w_out, b_out)
    out = jax.block_until_ready(out)

    ref = reference_forward(x, gamma, beta, w_qkv, w_out, b_out)
    assert jnp.allclose(out, ref, atol=1e-4, rtol=1e-4), "mismatch vs reference"

    # TODO(synk): nn.Dropout is p=0.0 (identity); no stochastic dropout implemented.
    print("KERNEL_OK")
</pallas_src>

<mosaic_0001>
module attributes {stable_mosaic.version = 11 : i64} {
  func.func @attention_kernel(%arg0: i32, %arg1: memref<16x32xf32, #tpu.memory_space<vmem>>, %arg2: memref<1x32xf32, #tpu.memory_space<vmem>>, %arg3: memref<1x32xf32, #tpu.memory_space<vmem>>, %arg4: memref<12x32x16xf32, #tpu.memory_space<vmem>>, %arg5: memref<4x16x32xf32, #tpu.memory_space<vmem>>, %arg6: memref<1x32xf32, #tpu.memory_space<vmem>>, %arg7: memref<64x64xf32, #tpu.memory_space<vmem>>, %arg8: memref<16x32xf32, #tpu.memory_space<vmem>>) attributes {dimension_semantics = [#tpu.dimension_semantics<arbitrary>], iteration_bounds = array<i64: 1>, scalar_prefetch = 0 : i64, scratch_operands = 0 : i64, tpu.core_type = #tpu.core_type<tc>, window_params = [{pipeline_mode = #tpu.pipeline_mode<synchronous>, transform_indices = @transform_0, window_bounds = array<i64: 16, 32>}, {pipeline_mode = #tpu.pipeline_mode<synchronous>, transform_indices = @transform_1, window_bounds = array<i64: 1, 32>}, {pipeline_mode = #tpu.pipeline_mode<synchronous>, transform_indices = @transform_2, window_bounds = array<i64: 1, 32>}, {pipeline_mode = #tpu.pipeline_mode<synchronous>, transform_indices = @transform_3, window_bounds = array<i64: 12, 32, 16>}, {pipeline_mode = #tpu.pipeline_mode<synchronous>, transform_indices = @transform_4, window_bounds = array<i64: 4, 16, 32>}, {pipeline_mode = #tpu.pipeline_mode<synchronous>, transform_indices = @transform_5, window_bounds = array<i64: 1, 32>}, {pipeline_mode = #tpu.pipeline_mode<synchronous>, transform_indices = @transform_6, window_bounds = array<i64: 64, 64>}, {pipeline_mode = #tpu.pipeline_mode<synchronous>, transform_indices = @transform_7, window_bounds = array<i64: 16, 32>}]} {
    %c0 = arith.constant 0 : index
    %c0_0 = arith.constant 0 : index
    %0 = vector.load %arg1[%c0, %c0_0] : memref<16x32xf32, #tpu.memory_space<vmem>>, vector<16x32xf32>
    %cst = arith.constant dense<0.000000e+00> : vector<16xf32>
    %1 = vector.multi_reduction <add>, %0, %cst [1] : vector<16x32xf32> to vector<16xf32>
    %2 = vector.shape_cast %1 : vector<16xf32> to vector<16x1xf32>
    %cst_1 = arith.constant 3.200000e+01 : f32
    %3 = vector.broadcast %cst_1 : f32 to vector<16x1xf32>
    %4 = arith.divf %2, %3 : vector<16x1xf32>
    %5 = vector.broadcast %4 : vector<16x1xf32> to vector<16x32xf32>
    %6 = arith.subf %0, %5 : vector<16x32xf32>
    %7 = arith.mulf %6, %6 : vector<16x32xf32>
    %cst_2 = arith.constant dense<0.000000e+00> : vector<16xf32>
    %8 = vector.multi_reduction <add>, %7, %cst_2 [1] : vector<16x32xf32> to vector<16xf32>
    %9 = vector.shape_cast %8 : vector<16xf32> to vector<16x1xf32>
    %cst_3 = arith.constant 3.200000e+01 : f32
    %10 = vector.broadcast %cst_3 : f32 to vector<16x1xf32>
    %11 = arith.divf %9, %10 : vector<16x1xf32>
    %12 = vector.broadcast %4 : vector<16x1xf32> to vector<16x32xf32>
    %13 = arith.subf %0, %12 : vector<16x32xf32>
    %cst_4 = arith.constant 9.99999974E-6 : f32
    %14 = vector.broadcast %cst_4 : f32 to vector<16x1xf32>
    %15 = arith.addf %11, %14 : vector<16x1xf32>
    %16 = math.rsqrt %15 : vector<16x1xf32>
    %17 = vector.broadcast %16 : vector<16x1xf32> to vector<16x32xf32>
    %18 = arith.mulf %13, %17 : vector<16x32xf32>
    %c0_5 = arith.constant 0 : index
    %c0_6 = arith.constant 0 : index
    %19 = vector.load %arg2[%c0_5, %c0_6] : memref<1x32xf32, #tpu.memory_space<vmem>>, vector<1x32xf32>
    %20 = vector.broadcast %19 : vector<1x32xf32> to vector<16x32xf32>
    %21 = arith.mulf %18, %20 : vector<16x32xf32>
    %c0_7 = arith.constant 0 : index
    %c0_8 = arith.constant 0 : index
    %22 = vector.load %arg3[%c0_7, %c0_8] : memref<1x32xf32, #tpu.memory_space<vmem>>, vector<1x32xf32>
    %23 = vector.broadcast %22 : vector<1x32xf32> to vector<16x32xf32>
    %24 = arith.addf %21, %23 : vector<16x32xf32>
    %25 = vector.shape_cast %24 : vector<16x32xf32> to vector<1x16x32xf32>
    %26 = vector.broadcast %25 : vector<1x16x32xf32> to vector<12x16x32xf32>
    %c0_9 = arith.constant 0 : index
    %c0_10 = arith.constant 0 : index
    %c0_11 = arith.constant 0 : index
    %27 = vector.load %arg4[%c0_9, %c0_10, %c0_11] : memref<12x32x16xf32, #tpu.memory_space<vmem>>, vector<12x32x16xf32>
    "tpu.trace_start"() <{level = 10 : i32, message = "gnc,gcd->gnd"}> : () -> ()
    %cst_12 = arith.constant dense<0.000000e+00> : vector<12x16x16xf32>
    %28 = tpu.matmul %26, %27, %cst_12 {dimension_numbers = #tpu.dot_dimension_numbers<[2], [1], [1], [2], [0, 0, 0, 1, 1, 2], [0], [0]>} : vector<12x16x32xf32>, vector<12x32x16xf32>, vector<12x16x16xf32> -> vector<12x16x16xf32>
    "tpu.trace_stop"() : () -> ()
    %29 = vector.extract_strided_slice %28 {offsets = [0, 0, 0], sizes = [4, 16, 16], strides = [1, 1, 1]} : vector<12x16x16xf32> to vector<4x16x16xf32>
    %30 = vector.shape_cast %29 : vector<4x16x16xf32> to vector<64x16xf32>
    %31 = vector.extract_strided_slice %28 {offsets = [4, 0, 0], sizes = [4, 16, 16], strides = [1, 1, 1]} : vector<12x16x16xf32> to vector<4x16x16xf32>
    %32 = vector.shape_cast %31 : vector<4x16x16xf32> to vector<64x16xf32>
    %33 = vector.extract_strided_slice %28 {offsets = [8, 0, 0], sizes = [4, 16, 16], strides = [1, 1, 1]} : vector<12x16x16xf32> to vector<4x16x16xf32>
    %34 = vector.shape_cast %33 : vector<4x16x16xf32> to vector<64x16xf32>
    "tpu.trace_start"() <{level = 10 : i32, message = "nd,md->nm"}> : () -> ()
    %cst_13 = arith.constant dense<0.000000e+00> : vector<64x64xf32>
    %35 = tpu.matmul %30, %32, %cst_13 {dimension_numbers = #tpu.dot_dimension_numbers<[1], [1], [0], [0], [0, 0, 1, 0], [], []>} : vector<64x16xf32>, vector<64x16xf32>, vector<64x64xf32> -> vector<64x64xf32>
    "tpu.trace_stop"() : () -> ()
    %cst_14 = arith.constant 2.500000e-01 : f32
    %36 = vector.broadcast %cst_14 : f32 to vector<64x64xf32>
    %37 = arith.mulf %35, %36 : vector<64x64xf32>
    %c0_15 = arith.constant 0 : index
    %c0_16 = arith.constant 0 : index
    %38 = vector.load %arg7[%c0_15, %c0_16] : memref<64x64xf32, #tpu.memory_space<vmem>>, vector<64x64xf32>
    %39 = arith.addf %37, %38 : vector<64x64xf32>
    %cst_17 = arith.constant dense<0xFF800000> : vector<64xf32>
    %40 = vector.multi_reduction <maximumf>, %39, %cst_17 [1] : vector<64x64xf32> to vector<64xf32>
    %41 = vector.shape_cast %40 : vector<64xf32> to vector<64x1xf32>
    %42 = vector.broadcast %41 : vector<64x1xf32> to vector<64x64xf32>
    %43 = arith.subf %39, %42 : vector<64x64xf32>
    %44 = math.exp %43 : vector<64x64xf32>
    %cst_18 = arith.constant dense<0.000000e+00> : vector<64xf32>
    %45 = vector.multi_reduction <add>, %44, %cst_18 [1] : vector<64x64xf32> to vector<64xf32>
    %46 = vector.shape_cast %45 : vector<64xf32> to vector<64x1xf32>
    %47 = tpu.reciprocal %46 : vector<64x1xf32> -> vector<64x1xf32>
    %48 = vector.broadcast %47 : vector<64x1xf32> to vector<64x64xf32>
    %49 = arith.mulf %44, %48 : vector<64x64xf32>
    %cst_19 = arith.constant dense<0.000000e+00> : vector<64x16xf32>
    %50 = tpu.matmul %49, %34, %cst_19 {dimension_numbers = #tpu.dot_dimension_numbers<[1], [0], [0], [1], [0, 0, 1, 1], [], []>} : vector<64x64xf32>, vector<64x16xf32>, vector<64x16xf32> -> vector<64x16xf32>
    %51 = vector.shape_cast %50 : vector<64x16xf32> to vector<4x16x16xf32>
    %c0_20 = arith.constant 0 : index
    %c0_21 = arith.constant 0 : index
    %c0_22 = arith.constant 0 : index
    %52 = vector.load %arg5[%c0_20, %c0_21, %c0_22] : memref<4x16x32xf32, #tpu.memory_space<vmem>>, vector<4x16x32xf32>
    "tpu.trace_start"() <{level = 10 : i32, message = "hnd,hdc->hnc"}> : () -> ()
    %cst_23 = arith.constant dense<0.000000e+00> : vector<4x16x32xf32>
    %53 = tpu.matmul %51, %52, %cst_23 {dimension_numbers = #tpu.dot_dimension_numbers<[2], [1], [1], [2], [0, 0, 0, 1, 1, 2], [0], [0]>} : vector<4x16x16xf32>, vector<4x16x32xf32>, vector<4x16x32xf32> -> vector<4x16x32xf32>
    "tpu.trace_stop"() : () -> ()
    %cst_24 = arith.constant dense<0.000000e+00> : vector<16x32xf32>
    %54 = vector.multi_reduction <add>, %53, %cst_24 [0] : vector<4x16x32xf32> to vector<16x32xf32>
    %c0_25 = arith.constant 0 : index
    %c0_26 = arith.constant 0 : index
    %55 = vector.load %arg6[%c0_25, %c0_26] : memref<1x32xf32, #tpu.memory_space<vmem>>, vector<1x32xf32>
    %56 = vector.broadcast %55 : vector<1x32xf32> to vector<16x32xf32>
    %57 = arith.addf %54, %56 : vector<16x32xf32>
    %c0_27 = arith.constant 0 : index
    %c0_28 = arith.constant 0 : index
    %58 = vector.load %arg8[%c0_27, %c0_28] : memref<16x32xf32, #tpu.memory_space<vmem>>, vector<16x32xf32>
    tpu.vector_store %arg8[%c0_27, %c0_28], %57 {strides = array<i32>} : memref<16x32xf32, #tpu.memory_space<vmem>>, vector<16x32xf32>,
    return
  }
  func.func @transform_0(%arg0: i32) -> (i32, i32) {
    %c0_i32 = arith.constant 0 : i32
    %c0_i32_0 = arith.constant 0 : i32
    %c0_i32_1 = arith.constant 0 : i32
    return %c0_i32, %c0_i32_0 : i32, i32
  }
  func.func @transform_1(%arg0: i32) -> (i32, i32) {
    %c0_i32 = arith.constant 0 : i32
    %c0_i32_0 = arith.constant 0 : i32
    %c0_i32_1 = arith.constant 0 : i32
    return %c0_i32, %c0_i32_0 : i32, i32
  }
  func.func @transform_2(%arg0: i32) -> (i32, i32) {
    %c0_i32 = arith.constant 0 : i32
    %c0_i32_0 = arith.constant 0 : i32
    %c0_i32_1 = arith.constant 0 : i32
    return %c0_i32, %c0_i32_0 : i32, i32
  }
  func.func @transform_3(%arg0: i32) -> (i32, i32, i32) {
    %c0_i32 = arith.constant 0 : i32
    %c0_i32_0 = arith.constant 0 : i32
    %c0_i32_1 = arith.constant 0 : i32
    %c0_i32_2 = arith.constant 0 : i32
    return %c0_i32, %c0_i32_0, %c0_i32_1 : i32, i32, i32
  }
  func.func @transform_4(%arg0: i32) -> (i32, i32, i32) {
    %c0_i32 = arith.constant 0 : i32
    %c0_i32_0 = arith.constant 0 : i32
    %c0_i32_1 = arith.constant 0 : i32
    %c0_i32_2 = arith.constant 0 : i32
    return %c0_i32, %c0_i32_0, %c0_i32_1 : i32, i32, i32
  }
  func.func @transform_5(%arg0: i32) -> (i32, i32) {
    %c0_i32 = arith.constant 0 : i32
    %c0_i32_0 = arith.constant 0 : i32
    %c0_i32_1 = arith.constant 0 : i32
    return %c0_i32, %c0_i32_0 : i32, i32
  }
  func.func @transform_6(%arg0: i32) -> (i32, i32) {
    %c0_i32 = arith.constant 0 : i32
    %c0_i32_0 = arith.constant 0 : i32
    %c0_i32_1 = arith.constant 0 : i32
    return %c0_i32, %c0_i32_0 : i32, i32
  }
  func.func @transform_7(%arg0: i32) -> (i32, i32) {
    %c0_i32 = arith.constant 0 : i32
    %c0_i32_0 = arith.constant 0 : i32
    %c0_i32_1 = arith.constant 0 : i32
    return %c0_i32, %c0_i32_0 : i32, i32
  }
}

</mosaic_0001>

<bundles_post_ra>
// kernel: tpu_custom_call.1
= control target key start
LH: loop header
LB: loop body
LE: loop exit
PB: predicated region body
PF: predicated region fallthrough
CT: control target
= control target key end

     0   :  { %vm29_vm0 = vcmask 261120   ;;  %s2629_s0 = inlined_call_operand.vmem [shape: f32[16,32], index: 0, kind: input, shape index: {}]   ;;  %s2630_s1 = inlined_call_operand.vmem [shape: f32[1,32], index: 1, kind: input, shape index: {}]   ;;  %s2631_s2 = inlined_call_operand.vmem [shape: f32[1,32], index: 2, kind: input, shape index: {}]   ;;  %s2632_s3 = inlined_call_operand.vmem [shape: f32[12,32,16], index: 3, kind: input, shape index: {}]   ;;  %s2633_s4 = inlined_call_operand.vmem [shape: f32[4,16,32], index: 4, kind: input, shape index: {}]   ;;  %s2634_s5 = inlined_call_operand.vmem [shape: f32[1,32], index: 5, kind: input, shape index: {}]   ;;  %s2635_s6 = inlined_call_operand.vmem [shape: f32[64,64], index: 6, kind: input, shape index: {}]   ;;  %s2636_s7 = inlined_call_operand.hbm [shape: f32[16,32], index: 7, kind: output, shape index: {}]  }
   0x1   :  { %v27_v0 = vld [vmem:[%s2629_s0] sm:$0xff]  ;;  %v28_v1 = vld [vmem:[%s2629_s0 + $0x8] sm:$0xff] }
   0x2   :  { %12 = vsyncpa [#allocation3], 0  ;;  %v30_v2 = vsel %vm29_vm0, %v27_v0, 0.0  ;;  %v33_v3 = vsel %vm29_vm0, %v28_v1, 0.0  ;;  %v78_v14 = vld [vmem:[%s2632_s3 + $0x18] sm:$0xff]  ;;  %v77_v16 = vld [vmem:[%s2632_s3 + $0x10] sm:$0xff] }
   0x3   :  { %31 = vadd.xlane.f32.xlu0 %v30_v2  ;;  %v82_v15 = vld [vmem:[%s2632_s3 + $0x38] sm:$0xff]  ;;  %1977 = vmatprep.subr.mxu0 %v78_v14  ;;  %v81_v17 = vld [vmem:[%s2632_s3 + $0x30] sm:$0xff]  ;;  %v76_v18 = vld [vmem:[%s2632_s3 + $0x8] sm:$0xff]  ;;  %vm1029_vm1 = vcmask 130048   ;;  %vm1207_vm2 = vcmask 523264  }
   0x4   :  { %1988 = vmatprep.subr.mxu1 %v82_v15  ;;  %1978 = vmatpush3.msra.mxu0 %v78_v14  ;;  %v80_v19 = vld [vmem:[%s2632_s3 + $0x28] sm:$0xff]  ;;  %v75_v20 = vld [vmem:[%s2632_s3] sm:$0xff]  ;;  %v86_v22 = vld [vmem:[%s2632_s3 + $0x58] sm:$0xff] }
   0x5   :  { %1989 = vmatpush3.msra.mxu1 %v82_v15  ;;  %1979 = vmatprep.subr.mxu0 %v77_v16  ;;  %v79_v21 = vld [vmem:[%s2632_s3 + $0x20] sm:$0xff]  ;;  %v90_v23 = vld [vmem:[%s2632_s3 + $0x78] sm:$0xff]  ;;  %v85_v40 = vld [vmem:[%s2632_s3 + $0x50] sm:$0xff] }
   0x6   :  { %1990 = vmatprep.subr.mxu1 %v81_v17  ;;  %1980 = vmatpush3.msra.mxu0 %v77_v16  ;;  %v1798_v31 = vld [vmem:[%s2630_s1] ss:$0 sm:$0xff]  ;;  %v89_v41 = vld [vmem:[%s2632_s3 + $0x70] sm:$0xff]  ;;  %v84_v42 = vld [vmem:[%s2632_s3 + $0x48] sm:$0xff] }
   0x7   :  { %34 = vadd.xlane.f32.xlu0 %v33_v3  ;;  %1991 = vmatpush3.msra.mxu1 %v81_v17  ;;  %v1799_v33 = vld [vmem:[%s2631_s2] ss:$0 sm:$0xff]  ;;  %v88_v43 = vld [vmem:[%s2632_s3 + $0x68] sm:$0xff]  ;;  %v94_v46 = vld [vmem:[%s2632_s3 + $0x98] sm:$0xff]  ;;  %s2254_s2 = smov [#allocation2]  }
   0x8   :  { %1981 = vmatprep.subr.mxu0 %v76_v18  ;;  %1992 = vmatprep.subr.mxu1 %v80_v19  ;;  %v83_v44 = vld [vmem:[%s2632_s3 + $0x40] sm:$0xff]  ;;  %v98_v47 = vld [vmem:[%s2632_s3 + $0xb8] sm:$0xff]  ;;  %v93_v48 = vld [vmem:[%s2632_s3 + $0x90] sm:$0xff]  ;;  %s1787_s28 = sshll.u32 %s2254_s2, 4  ;;  %s1788_s28 = int_to_ptr.vmem [resolvable:$true] %s1787_s28 }
   0x9   :  { %1982 = vmatpush3.msra.mxu0 %v76_v18  ;;  %1993 = vmatpush3.msra.mxu1 %v80_v19  ;;  %v87_v45 = vld [vmem:[%s2632_s3 + $0x60] sm:$0xff]  ;;  %v97_v49 = vld [vmem:[%s2632_s3 + $0xb0] sm:$0xff]  ;;  %v92_v50 = vld [vmem:[%s2632_s3 + $0x88] sm:$0xff]  ;;  %s2232_s29 = scalar_lea.vmem %s1788_s28, 256  ;;  %p2237_p1 = scmp.lt.s32.totalorder %s1788_s28, %s1788_s28 }
   0xa   :  { %1983 = vmatprep.subr.mxu0 %v75_v20  ;;  %1994 = vmatprep.subr.mxu1 %v79_v21  ;;  %v96_v51 = vld [vmem:[%s2632_s3 + $0xa8] sm:$0xff]  ;;  %v91_v52 = vld [vmem:[%s2632_s3 + $0x80] sm:$0xff]  ;;  %v102_v54 = vld [vmem:[%s2632_s3 + $0xd8] sm:$0xff]  ;;  %p2233_p0 = scmp.ne.s32.totalorder %s1788_s28, %s2232_s29  ;;  %p2238_p2 = scmp.lt.s32.totalorder %s2232_s29, %s2232_s29 }
   0xb   :  { %1984 = vmatpush3.msra.mxu0 %v75_v20  ;;  %1995 = vmatpush3.msra.mxu1 %v79_v21  ;;  %v95_v53 = vld [vmem:[%s2632_s3 + $0xa0] sm:$0xff]  ;;  %v106_v55 = vld [vmem:[%s2632_s3 + $0xf8] sm:$0xff]  ;;  %v101_v56 = vld [vmem:[%s2632_s3 + $0xd0] sm:$0xff] }
   0xc   :  { %1999 = vmatprep.subr.mxu0 %v86_v22  ;;  %2010 = vmatprep.subr.mxu1 %v90_v23  ;;  %v105_v57 = vld [vmem:[%s2632_s3 + $0xf0] sm:$0xff]  ;;  %v100_v58 = vld [vmem:[%s2632_s3 + $0xc8] sm:$0xff]  ;;  %v99_v60 = vld [vmem:[%s2632_s3 + $0xc0] sm:$0xff]  ;;  %p2239_p3 = por %p2238_p2, %p2237_p1 }
   0xd   :  { %v104_v59 = vld [vmem:[%s2632_s3 + $0xe8] sm:$0xff]  ;;  %v103_v61 = vld [vmem:[%s2632_s3 + $0xe0] sm:$0xff]  ;;  %v110_v62 = vld [vmem:[%s2632_s3 + $0x118] sm:$0xff] }
   0xe   :  { %v114_v63 = vld [vmem:[%s2632_s3 + $0x138] sm:$0xff]  ;;  %v108_v2 = vld [vmem:[%s2632_s3 + $0x108] sm:$0xff]  ;;  %p2240_p4 = pnand %p2239_p3, %p2233_p0 }
   0xf   :  { %v112_v3 = vld [vmem:[%s2632_s3 + $0x128] sm:$0xff] }
  0x8c   :  { %v32_v4 = vpop.xlane.xlu0 %31 }
  0x8d   :  { %v37_v5 = vmul.f32 0.03125, %v32_v4  ;;  %v107_v4 = vld [vmem:[%s2632_s3 + $0x100] sm:$0xff] }
  0x8f   :  { %v39_v6 = vsub.f32 %v27_v0, %v37_v5  ;;  %v109_v0 = vld [vmem:[%s2632_s3 + $0x110] sm:$0xff]  ;;  %v111_v5 = vld [vmem:[%s2632_s3 + $0x120] sm:$0xff] }
  0x90   :  { %v35_v7 = vpop.xlane.xlu0 %34 }
  0x91   :  { %v38_v8 = vmul.f32 0.03125, %v35_v7  ;;  %v41_v9 = vmul.f32 %v39_v6, %v39_v6  ;;  %v122_v7 = vld [vmem:[%s2632_s3 + $0x178] sm:$0xff] }
  0x93   :  { %v40_v10 = vsub.f32 %v28_v1, %v38_v8  ;;  %v43_v11 = vsel %vm29_vm0, %v41_v9, 0.0  ;;  %v113_v1 = vld [vmem:[%s2632_s3 + $0x130] sm:$0xff] }
  0x94   :  { %44 = vadd.xlane.f32.xlu1 %v43_v11  ;;  %v117_v8 = vld [vmem:[%s2632_s3 + $0x150] sm:$0xff]  ;;  %v120_v11 = vld [vmem:[%s2632_s3 + $0x168] sm:$0xff] }
  0x95   :  { %v42_v12 = vmul.f32 %v40_v10, %v40_v10  ;;  %v121_v9 = vld [vmem:[%s2632_s3 + $0x170] sm:$0xff] }
  0x97   :  { %v46_v13 = vsel %vm29_vm0, %v42_v12, 0.0  ;;  %v115_v12 = vld [vmem:[%s2632_s3 + $0x140] sm:$0xff] }
  0x98   :  { %47 = vadd.xlane.f32.xlu1 %v46_v13  ;;  %v119_v13 = vld [vmem:[%s2632_s3 + $0x160] sm:$0xff] }
 0x11d   :  { %v45_v24 = vpop.xlane.xlu1 %44 }
 0x11e   :  { %v49_v25 = vmul.f32 0.03125, %v45_v24 }
 0x120   :  { %v51_v26 = vadd.f32 1e-05, %v49_v25 }
 0x121   :  { %v48_v27 = vpop.xlane.xlu1 %47 }
 0x122   :  { %2196 = vrsqrt.f32 %v51_v26  ;;  %v50_v28 = vmul.f32 0.03125, %v48_v27 }
 0x124   :  { %v52_v29 = vadd.f32 1e-05, %v50_v28 }
 0x126   :  { %2198 = vrsqrt.f32 %v52_v29 }
 0x12f   :  { %v2197_v30 = vpop.eup %2196 }
 0x130   :  { %v55_v32 = vmul.f32 %v2197_v30, %v39_v6  ;;  %v118_v6 = vld [vmem:[%s2632_s3 + $0x158] sm:$0xff] }
 0x132   :  { %v64_v34 = vmul.f32 %v1798_v31, %v55_v32 }
 0x133   :  { %v2199_v35 = vpop.eup %2198 }
 0x134   :  { %v2343_v36 = vadd.f32 %v1799_v33, %v64_v34  ;;  %v56_v37 = vmul.f32 %v2199_v35, %v40_v10  ;;  %v116_v10 = vld [vmem:[%s2632_s3 + $0x148] sm:$0xff] }
 0x136   :  { %v65_v38 = vmul.f32 %v1798_v31, %v56_v37  ;;  %1985 = vmatprep.mubr.msk.f32.mxu0 %vm29_vm0, %v2343_v36  ;;  %1996 = vmatprep.mubr.msk.f32.mxu1 %vm29_vm0, %v2343_v36 }
 0x138   :  { %v2349_v39 = vadd.f32 %v1799_v33, %v65_v38 }
 0x13a   :  { %1986 = vmatmul.mubr.msk.f32.vlgmr.msra.gmra.mxu0 %vm29_vm0, %v2349_v39  ;;  %1997 = vmatmul.mubr.msk.f32.vlgmr.msra.gmra.mxu1 %vm29_vm0, %v2349_v39 }
 0x13b   :  { %2000 = vmatpush3.msra.mxu0 %v86_v22  ;;  %2011 = vmatpush3.msra.mxu1 %v90_v23 }
 0x13c   :  { %2001 = vmatprep.subr.mxu0 %v85_v40  ;;  %2007 = vmatprep.mubr.msk.f32.mxu0 %vm29_vm0, %v2343_v36 }
 0x13d   :  { %2012 = vmatprep.subr.mxu1 %v89_v41  ;;  %2018 = vmatprep.mubr.msk.f32.mxu1 %vm29_vm0, %v2343_v36 }
 0x13e   :  { %2002 = vmatpush3.msra.mxu0 %v85_v40  ;;  %2013 = vmatpush3.msra.mxu1 %v89_v41 }
 0x13f   :  { %2003 = vmatprep.subr.mxu0 %v84_v42  ;;  %2014 = vmatprep.subr.mxu1 %v88_v43 }
 0x140   :  { %2004 = vmatpush3.msra.mxu0 %v84_v42  ;;  %2015 = vmatpush3.msra.mxu1 %v88_v43  ;;  %v1191_v42 = vld [vmem:[%s2635_s6] sm:$0xff] }
 0x141   :  { %2005 = vmatprep.subr.mxu0 %v83_v44  ;;  %2016 = vmatprep.subr.mxu1 %v87_v45 }
 0x142   :  { %2006 = vmatpush3.msra.mxu0 %v83_v44  ;;  %2017 = vmatpush3.msra.mxu1 %v87_v45 }
 0x143   :  { %2008 = vmatmul.mubr.msk.f32.vlgmr.msra.gmra.mxu0 %vm29_vm0, %v2349_v39  ;;  %2019 = vmatmul.mubr.msk.f32.vlgmr.msra.gmra.mxu1 %vm29_vm0, %v2349_v39 }
 0x144   :  { %2021 = vmatprep.subr.mxu0 %v94_v46  ;;  %2032 = vmatprep.subr.mxu1 %v98_v47 }
 0x145   :  { %2022 = vmatpush3.msra.mxu0 %v94_v46  ;;  %2029 = vmatprep.mubr.msk.f32.mxu0 %vm29_vm0, %v2343_v36  ;;  %v1194_v46 = vld [vmem:[%s2635_s6 + $0x18] sm:$0xff] }
 0x146   :  { %2033 = vmatpush3.msra.mxu1 %v98_v47  ;;  %2040 = vmatprep.mubr.msk.f32.mxu1 %vm29_vm0, %v2343_v36 }
 0x147   :  { %2023 = vmatprep.subr.mxu0 %v93_v48  ;;  %2034 = vmatprep.subr.mxu1 %v97_v49 }
 0x148   :  { %2024 = vmatpush3.msra.mxu0 %v93_v48  ;;  %2035 = vmatpush3.msra.mxu1 %v97_v49 }
 0x149   :  { %2025 = vmatprep.subr.mxu0 %v92_v50  ;;  %2036 = vmatprep.subr.mxu1 %v96_v51 }
 0x14a   :  { %2026 = vmatpush3.msra.mxu0 %v92_v50  ;;  %2037 = vmatpush3.msra.mxu1 %v96_v51  ;;  %v1193_v51 = vld [vmem:[%s2635_s6 + $0x10] sm:$0xff] }
 0x14b   :  { %2027 = vmatprep.subr.mxu0 %v91_v52  ;;  %2038 = vmatprep.subr.mxu1 %v95_v53 }
 0x14c   :  { %2028 = vmatpush3.msra.mxu0 %v91_v52  ;;  %2039 = vmatpush3.msra.mxu1 %v95_v53 }
 0x14d   :  { %2030 = vmatmul.mubr.msk.f32.vlgmr.msra.gmra.mxu0 %vm29_vm0, %v2349_v39  ;;  %2041 = vmatmul.mubr.msk.f32.vlgmr.msra.gmra.mxu1 %vm29_vm0, %v2349_v39 }
 0x14e   :  { %2043 = vmatprep.subr.mxu0 %v102_v54  ;;  %2054 = vmatprep.subr.mxu1 %v106_v55 }
 0x14f   :  { %2044 = vmatpush3.msra.mxu0 %v102_v54  ;;  %2051 = vmatprep.mubr.msk.f32.mxu0 %vm29_vm0, %v2343_v36 }
 0x150   :  { %2055 = vmatpush3.msra.mxu1 %v106_v55  ;;  %2062 = vmatprep.mubr.msk.f32.mxu1 %vm29_vm0, %v2343_v36 }
 0x151   :  { %2045 = vmatprep.subr.mxu0 %v101_v56  ;;  %2056 = vmatprep.subr.mxu1 %v105_v57 }
 0x152   :  { %2046 = vmatpush3.msra.mxu0 %v101_v56  ;;  %2057 = vmatpush3.msra.mxu1 %v105_v57  ;;  %v1196_v56 = vld [vmem:[%s2635_s6 + $0x28] sm:$0xff] }
 0x153   :  { %2047 = vmatprep.subr.mxu0 %v100_v58  ;;  %2058 = vmatprep.subr.mxu1 %v104_v59 }
 0x154   :  { %2048 = vmatpush3.msra.mxu0 %v100_v58  ;;  %2059 = vmatpush3.msra.mxu1 %v104_v59 }
 0x155   :  { %2049 = vmatprep.subr.mxu0 %v99_v60  ;;  %2060 = vmatprep.subr.mxu1 %v103_v61 }
 0x156   :  { %2050 = vmatpush3.msra.mxu0 %v99_v60  ;;  %2061 = vmatpush3.msra.mxu1 %v103_v61  ;;  %v1195_v61 = vld [vmem:[%s2635_s6 + $0x20] sm:$0xff] }
 0x157   :  { %2052 = vmatmul.mubr.msk.f32.vlgmr.msra.gmra.mxu0 %vm29_vm0, %v2349_v39  ;;  %2063 = vmatmul.mubr.msk.f32.vlgmr.msra.gmra.mxu1 %vm29_vm0, %v2349_v39 }
 0x158   :  { %2065 = vmatprep.subr.mxu0 %v110_v62  ;;  %2076 = vmatprep.subr.mxu1 %v114_v63 }
 0x159   :  { %2066 = vmatpush3.msra.mxu0 %v110_v62  ;;  %2073 = vmatprep.mubr.msk.f32.mxu0 %vm29_vm0, %v2343_v36 }
 0x15a   :  { %2077 = vmatpush3.msra.mxu1 %v114_v63  ;;  %2084 = vmatprep.mubr.msk.f32.mxu1 %vm29_vm0, %v2343_v36 }
 0x15b   :  { %2067 = vmatprep.subr.mxu0 %v109_v0  ;;  %2078 = vmatprep.subr.mxu1 %v113_v1 }
 0x15c   :  { %2068 = vmatpush3.msra.mxu0 %v109_v0  ;;  %2079 = vmatpush3.msra.mxu1 %v113_v1 }
 0x15d   :  { %2069 = vmatprep.subr.mxu0 %v108_v2  ;;  %2080 = vmatprep.subr.mxu1 %v112_v3 }
 0x15e   :  { %2070 = vmatpush3.msra.mxu0 %v108_v2  ;;  %2081 = vmatpush3.msra.mxu1 %v112_v3  ;;  %v1198_v2 = vld [vmem:[%s2635_s6 + $0x38] sm:$0xff] }
 0x15f   :  { %2071 = vmatprep.subr.mxu0 %v107_v4  ;;  %2082 = vmatprep.subr.mxu1 %v111_v5 }
 0x160   :  { %2072 = vmatpush3.msra.mxu0 %v107_v4  ;;  %2083 = vmatpush3.msra.mxu1 %v111_v5 }
 0x161   :  { %2074 = vmatmul.mubr.msk.f32.vlgmr.msra.gmra.mxu0 %vm29_vm0, %v2349_v39  ;;  %2085 = vmatmul.mubr.msk.f32.vlgmr.msra.gmra.mxu1 %vm29_vm0, %v2349_v39 }
 0x162   :  { %2087 = vmatprep.subr.mxu0 %v118_v6  ;;  %2098 = vmatprep.subr.mxu1 %v122_v7 }
 0x163   :  { %2088 = vmatpush3.msra.mxu0 %v118_v6  ;;  %2095 = vmatprep.mubr.msk.f32.mxu0 %vm29_vm0, %v2343_v36 }
 0x164   :  { %2099 = vmatpush3.msra.mxu1 %v122_v7  ;;  %2106 = vmatprep.mubr.msk.f32.mxu1 %vm29_vm0, %v2343_v36  ;;  %v1197_v7 = vld [vmem:[%s2635_s6 + $0x30] sm:$0xff] }
 0x165   :  { %2089 = vmatprep.subr.mxu0 %v117_v8  ;;  %2100 = vmatprep.subr.mxu1 %v121_v9 }
 0x166   :  { %2090 = vmatpush3.msra.mxu0 %v117_v8  ;;  %2101 = vmatpush3.msra.mxu1 %v121_v9 }
 0x167   :  { %2091 = vmatprep.subr.mxu0 %v116_v10  ;;  %2102 = vmatprep.subr.mxu1 %v120_v11 }
 0x168   :  { %2092 = vmatpush3.msra.mxu0 %v116_v10  ;;  %2103 = vmatpush3.msra.mxu1 %v120_v11 }
 0x169   :  { %2093 = vmatprep.subr.mxu0 %v115_v12  ;;  %2104 = vmatprep.subr.mxu1 %v119_v13 }
 0x16a   :  { %2094 = vmatpush3.msra.mxu0 %v115_v12  ;;  %2105 = vmatpush3.msra.mxu1 %v119_v13 }
 0x16b   :  { %2096 = vmatmul.mubr.msk.f32.vlgmr.msra.gmra.mxu0 %vm29_vm0, %v2349_v39  ;;  %2107 = vmatmul.mubr.msk.f32.vlgmr.msra.gmra.mxu1 %vm29_vm0, %v2349_v39  ;;  %v1192_v39 = vld [vmem:[%s2635_s6 + $0x8] sm:$0xff] }
 0x1fa   :  { %v1987_v14 = vpop.f32.mrf.mxu0  ;;  %v1998_v16 = vpop.f32.mrf.mxu1 }
 0x1fc   :  { %v195_v15 = vpop.f32.mrf.mxu0  ;;  %v270_v17 = vpop.f32.mrf.mxu1 }
 0x1fd   :  { %2125 = vmatprep.mubr.msk.f32.mxu0 %vm1029_vm1, %v195_v15 }
 0x203   :  { %v2020_v18 = vpop.f32.mrf.mxu1  ;;  %v2009_v20 = vpop.f32.mrf.mxu0 }
 0x205   :  { %v420_v19 = vpop.f32.mrf.mxu1  ;;  %v345_v22 = vpop.f32.mrf.mxu0 }
 0x20d   :  { %v2042_v21 = vpop.f32.mrf.mxu1  ;;  %v2031_v24 = vpop.f32.mrf.mxu0 }
 0x20f   :  { %v570_v23 = vpop.f32.mrf.mxu1  ;;  %v495_v27 = vpop.f32.mrf.mxu0 }
 0x217   :  { %v2064_v25 = vpop.f32.mrf.mxu1  ;;  %v2053_v28 = vpop.f32.mrf.mxu0 }
 0x218   :  { %2109 = vmatprep.subr.msk.mxu0 %vm1029_vm1, %v2064_v25 }
 0x219   :  { %v720_v26 = vpop.f32.mrf.mxu1  ;;  %2110 = vmatpush3.xpose.msk.msra.mxu0 %vm1029_vm1, %v2064_v25  ;;  %v645_v29 = vpop.f32.mrf.mxu0 }
 0x21a   :  { %2111 = vmatprep.subr.msk.mxu0 %vm1029_vm1, %v720_v26 }
 0x21d   :  { %2112 = vmatpush3.xpose.msk.msra.mxu0 %vm1029_vm1, %v720_v26 }
 0x21e   :  { %2113 = vmatprep.subr.msk.mxu0 %vm1029_vm1, %v2053_v28 }
 0x221   :  { %2114 = vmatpush3.xpose.msk.msra.mxu0 %vm1029_vm1, %v2053_v28  ;;  %v2086_v30 = vpop.f32.mrf.mxu1  ;;  %v2075_v31 = vpop.f32.mrf.mxu0 }
 0x222   :  { %2115 = vmatprep.subr.msk.mxu0 %vm1029_vm1, %v645_v29 }
 0x223   :  { %v870_v32 = vpop.f32.mrf.mxu1  ;;  %v795_v33 = vpop.f32.mrf.mxu0 }
 0x225   :  { %2116 = vmatpush3.xpose.msk.msra.mxu0 %vm1029_vm1, %v645_v29 }
 0x226   :  { %2117 = vmatprep.subr.msk.mxu0 %vm1029_vm1, %v2042_v21 }
 0x229   :  { %2118 = vmatpush3.xpose.msk.msra.mxu0 %vm1029_vm1, %v2042_v21 }
 0x22a   :  { %2119 = vmatprep.subr.msk.mxu0 %vm1029_vm1, %v570_v23 }
 0x22b   :  { %v2108_v34 = vpop.f32.mrf.mxu1  ;;  %v2097_v35 = vpop.f32.mrf.mxu0 }
 0x22c   :  { %2137 = vmatprep.subr.mxu1 %v2108_v34 }
 0x22d   :  { %v1020_v36 = vpop.f32.mrf.mxu1  ;;  %2138 = vmatpush3.msra.mxu1 %v2108_v34  ;;  %2120 = vmatpush3.xpose.msk.msra.mxu0 %vm1029_vm1, %v570_v23  ;;  %v945_v37 = vpop.f32.mrf.mxu0 }
 0x22e   :  { %2139 = vmatprep.subr.mxu1 %v1020_v36  ;;  %2121 = vmatprep.subr.msk.mxu0 %vm1029_vm1, %v2031_v24 }
 0x22f   :  { %2140 = vmatpush3.msra.mxu1 %v1020_v36 }
 0x230   :  { %2141 = vmatprep.subr.mxu1 %v2097_v35 }
 0x231   :  { %2142 = vmatpush3.msra.mxu1 %v2097_v35  ;;  %2122 = vmatpush3.xpose.msk.msra.mxu0 %vm1029_vm1, %v2031_v24 }
 0x232   :  { %2143 = vmatprep.subr.mxu1 %v945_v37  ;;  %2123 = vmatprep.subr.msk.mxu0 %vm1029_vm1, %v495_v27 }
 0x233   :  { %2144 = vmatpush3.msra.mxu1 %v945_v37 }
 0x234   :  { %2145 = vmatprep.subr.mxu1 %v2086_v30 }
 0x235   :  { %2146 = vmatpush3.msra.mxu1 %v2086_v30  ;;  %2124 = vmatpush3.xpose.msk.msra.mxu0 %vm1029_vm1, %v495_v27 }
 0x236   :  { %2147 = vmatprep.subr.mxu1 %v870_v32 }
 0x237   :  { %2148 = vmatpush3.msra.mxu1 %v870_v32 }
 0x238   :  { %2149 = vmatprep.subr.mxu1 %v2075_v31  ;;  %2126 = vmatmul.mubr.msk.f32.vlgmr.msra.gmra.mxu0 %vm1029_vm1, %v1987_v14 }
 0x239   :  { %2150 = vmatpush3.msra.mxu1 %v2075_v31  ;;  %2128 = vmatprep.mubr.msk.f32.mxu0 %vm1029_vm1, %v270_v17 }
 0x23a   :  { %2151 = vmatprep.subr.mxu1 %v795_v33 }
 0x23b   :  { %2152 = vmatpush3.msra.mxu1 %v795_v33 }
 0x23c   :  { %2129 = vmatmul.mubr.msk.f32.gmra.mxu0 %vm1029_vm1, %v1998_v16 }
 0x23d   :  { %2131 = vmatprep.mubr.msk.f32.mxu0 %vm1029_vm1, %v345_v22 }
 0x240   :  { %2132 = vmatmul.mubr.msk.f32.gmra.mxu0 %vm1029_vm1, %v2009_v20 }
 0x241   :  { %2134 = vmatprep.mubr.msk.f32.mxu0 %vm1029_vm1, %v420_v19 }
 0x244   :  { %2135 = vmatmul.mubr.msk.f32.gmra.mxu0 %vm1029_vm1, %v2020_v18 }
 0x2f8   :  { %v2127_v38 = vpop.f32.mrf.mxu0 }
 0x2f9   :  { %v1184_v40 = vmul.f32 0.25, %v2127_v38 }
 0x2fa   :  { %v1144_v41 = vpop.f32.mrf.mxu0 }
 0x2fb   :  { %v1183_v43 = vmul.f32 0.25, %v1144_v41  ;;  %v1200_v44 = vadd.f32 %v1192_v39, %v1184_v40 }
 0x2fc   :  { %v2130_v45 = vpop.f32.mrf.mxu0 }
 0x2fd   :  { %v1186_v47 = vmul.f32 0.25, %v2130_v45  ;;  %v1211_v48 = vsel %vm1207_vm2, %v1200_v44, -inf  ;;  %v1199_v49 = vadd.f32 %v1191_v42, %v1183_v43 }
 0x2fe   :  { %1212 = vmax.xlane.f32.xlu1 %v1211_v48  ;;  %v1154_v50 = vpop.f32.mrf.mxu0 }
 0x2ff   :  { %v1185_v52 = vmul.f32 0.25, %v1154_v50  ;;  %v1208_v53 = vsel %vm1207_vm2, %v1199_v49, -inf  ;;  %v1202_v54 = vadd.f32 %v1194_v46, %v1186_v47 }
 0x300   :  { %1209 = vmax.xlane.f32.xlu0 %v1208_v53  ;;  %v2133_v55 = vpop.f32.mrf.mxu0 }
 0x301   :  { %v1188_v57 = vmul.f32 0.25, %v2133_v55  ;;  %v1217_v58 = vsel %vm1207_vm2, %v1202_v54, -inf  ;;  %v1201_v59 = vadd.f32 %v1193_v51, %v1185_v52 }
 0x302   :  { %1218 = vmax.xlane.f32.xlu1 %v1217_v58  ;;  %v1164_v60 = vpop.f32.mrf.mxu0 }
 0x303   :  { %v1187_v62 = vmul.f32 0.25, %v1164_v60  ;;  %v1214_v63 = vsel %vm1207_vm2, %v1201_v59, -inf  ;;  %v1204_v0 = vadd.f32 %v1196_v56, %v1188_v57 }
 0x304   :  { %1215 = vmax.xlane.f32.xlu0 %v1214_v63  ;;  %v2136_v1 = vpop.f32.mrf.mxu0 }
 0x305   :  { %v1190_v3 = vmul.f32 0.25, %v2136_v1  ;;  %v1223_v4 = vsel %vm1207_vm2, %v1204_v0, -inf  ;;  %v1203_v5 = vadd.f32 %v1195_v61, %v1187_v62 }
 0x306   :  { %1224 = vmax.xlane.f32.xlu1 %v1223_v4  ;;  %v1174_v6 = vpop.f32.mrf.mxu0  ;;  %v1425_v4 = vld [vmem:[%s2633_s4] sm:$0xff] }
 0x307   :  { %v1189_v8 = vmul.f32 0.25, %v1174_v6  ;;  %v1220_v9 = vsel %vm1207_vm2, %v1203_v5, -inf  ;;  %v1206_v10 = vadd.f32 %v1198_v2, %v1190_v3 }
 0x308   :  { %1221 = vmax.xlane.f32.xlu0 %v1220_v9 }
 0x309   :  { %v1205_v11 = vadd.f32 %v1197_v7, %v1189_v8  ;;  %v1229_v12 = vsel %vm1207_vm2, %v1206_v10, -inf }
 0x30a   :  { %1230 = vmax.xlane.f32.xlu1 %v1229_v12 }
 0x30b   :  { %v1226_v13 = vsel %vm1207_vm2, %v1205_v11, -inf }
 0x30c   :  { %1227 = vmax.xlane.f32.xlu0 %v1226_v13 }
 0x387   :  { %v1213_v14 = vpop.xlane.xlu1 %1212 }
 0x388   :  { %v1233_v15 = vsub.f32 %v1200_v44, %v1213_v14 }
 0x389   :  { %v1210_v16 = vpop.xlane.xlu0 %1209 }
 0x38a   :  { %v1242_v17 = vmul.f32 1.442695, %v1233_v15  ;;  %v1232_v18 = vsub.f32 %v1199_v49, %v1210_v16  ;;  %v1428_v16 = vld [vmem:[%s2633_s4 + $0x18] sm:$0xff] }
 0x38b   :  { %v1219_v19 = vpop.xlane.xlu1 %1218 }
 0x38c   :  { %2200 = vpow2.f32 %v1242_v17  ;;  %v1240_v20 = vmul.f32 1.442695, %v1232_v18  ;;  %v1235_v21 = vsub.f32 %v1202_v54, %v1219_v19  ;;  %v1426_v54 = vld [vmem:[%s2633_s4 + $0x8] sm:$0xff]  ;;  %v1427_v19 = vld [vmem:[%s2633_s4 + $0x10] sm:$0xff] }
 0x38d   :  { %v1216_v22 = vpop.xlane.xlu0 %1215  ;;  %2165 = vmatprep.subr.mxu1 %v1426_v54 }
 0x38e   :  { %2202 = vpow2.f32 %v1240_v20  ;;  %v1246_v23 = vmul.f32 1.442695, %v1235_v21  ;;  %v1234_v24 = vsub.f32 %v1201_v59, %v1216_v22  ;;  %v1430_v21 = vld [vmem:[%s2633_s4 + $0x28] sm:$0xff] }
 0x38f   :  { %v1225_v25 = vpop.xlane.xlu1 %1224 }
 0x390   :  { %2204 = vpow2.f32 %v1246_v23  ;;  %v1244_v26 = vmul.f32 1.442695, %v1234_v24  ;;  %v1237_v27 = vsub.f32 %v1204_v0, %v1225_v25  ;;  %v1429_v23 = vld [vmem:[%s2633_s4 + $0x20] sm:$0xff]  ;;  %v1432_v25 = vld [vmem:[%s2633_s4 + $0x38] sm:$0xff] }
 0x391   :  { %v1222_v28 = vpop.xlane.xlu0 %1221 }
 0x392   :  { %2206 = vpow2.f32 %v1244_v26  ;;  %v1250_v29 = vmul.f32 1.442695, %v1237_v27  ;;  %v1236_v30 = vsub.f32 %v1203_v5, %v1222_v28  ;;  %v1431_v27 = vld [vmem:[%s2633_s4 + $0x30] sm:$0xff] }
 0x393   :  { %v1231_v31 = vpop.xlane.xlu1 %1230 }
 0x394   :  { %2208 = vpow2.f32 %v1250_v29  ;;  %v1248_v32 = vmul.f32 1.442695, %v1236_v30  ;;  %v1239_v33 = vsub.f32 %v1206_v10, %v1231_v31 }
 0x395   :  { %v1228_v34 = vpop.xlane.xlu0 %1227 }
 0x396   :  { %2210 = vpow2.f32 %v1248_v32  ;;  %v1254_v35 = vmul.f32 1.442695, %v1239_v33  ;;  %v1238_v36 = vsub.f32 %v1205_v11, %v1228_v34 }
 0x398   :  { %2212 = vpow2.f32 %v1254_v35  ;;  %v1252_v37 = vmul.f32 1.442695, %v1238_v36 }
 0x399   :  { %v2201_v38 = vpop.eup %2200 }
 0x39a   :  { %2214 = vpow2.f32 %v1252_v37  ;;  %v1259_v39 = vsel %vm1207_vm2, %v2201_v38, 0.0 }
 0x39b   :  { %v2203_v40 = vpop.eup %2202  ;;  %1260 = vadd.xlane.f32.xlu1 %v1259_v39 }
 0x39c   :  { %v1256_v41 = vsel %vm1207_vm2, %v2203_v40, 0.0 }
 0x39d   :  { %v2205_v42 = vpop.eup %2204  ;;  %1257 = vadd.xlane.f32.xlu0 %v1256_v41 }
 0x39e   :  { %v1265_v43 = vsel %vm1207_vm2, %v2205_v42, 0.0 }
 0x39f   :  { %v2207_v44 = vpop.eup %2206  ;;  %1266 = vadd.xlane.f32.xlu1 %v1265_v43 }
 0x3a0   :  { %v1262_v45 = vsel %vm1207_vm2, %v2207_v44, 0.0 }
 0x3a1   :  { %v2209_v46 = vpop.eup %2208  ;;  %1263 = vadd.xlane.f32.xlu0 %v1262_v45 }
 0x3a2   :  { %v1271_v47 = vsel %vm1207_vm2, %v2209_v46, 0.0 }
 0x3a3   :  { %v2211_v48 = vpop.eup %2210  ;;  %1272 = vadd.xlane.f32.xlu1 %v1271_v47  ;;  %v1856_v47 = vld [vmem:[%s2634_s5] ss:$0 sm:$0xff] }
 0x3a4   :  { %v1268_v49 = vsel %vm1207_vm2, %v2211_v48, 0.0 }
 0x3a5   :  { %v2213_v50 = vpop.eup %2212  ;;  %1269 = vadd.xlane.f32.xlu0 %v1268_v49 }
 0x3a6   :  { %v1277_v51 = vsel %vm1207_vm2, %v2213_v50, 0.0 }
 0x3a7   :  { %v2215_v52 = vpop.eup %2214  ;;  %1278 = vadd.xlane.f32.xlu1 %v1277_v51 }
 0x3a8   :  { %v1274_v53 = vsel %vm1207_vm2, %v2215_v52, 0.0 }
 0x3a9   :  { %1275 = vadd.xlane.f32.xlu0 %v1274_v53 }
 0x424   :  { %v1261_v55 = vpop.xlane.xlu1 %1260 }
 0x425   :  { %2216 = vrcp.f32 %v1261_v55 }
 0x426   :  { %v1258_v56 = vpop.xlane.xlu0 %1257 }
 0x427   :  { %2218 = vrcp.f32 %v1258_v56 }
 0x428   :  { %v1267_v57 = vpop.xlane.xlu1 %1266 }
 0x429   :  { %2220 = vrcp.f32 %v1267_v57 }
 0x42a   :  { %v1264_v58 = vpop.xlane.xlu0 %1263 }
 0x42b   :  { %2222 = vrcp.f32 %v1264_v58 }
 0x42c   :  { %v1273_v59 = vpop.xlane.xlu1 %1272 }
 0x42d   :  { %2224 = vrcp.f32 %v1273_v59 }
 0x42e   :  { %v1270_v60 = vpop.xlane.xlu0 %1269 }
 0x42f   :  { %2226 = vrcp.f32 %v1270_v60 }
 0x430   :  { %v1279_v61 = vpop.xlane.xlu1 %1278 }
 0x431   :  { %2228 = vrcp.f32 %v1279_v61 }
 0x432   :  { %v1276_v62 = vpop.xlane.xlu0 %1275  ;;  %v2217_v63 = vpop.eup %2216 }
 0x433   :  { %2230 = vrcp.f32 %v1276_v62  ;;  %v1289_v2 = vmul.f32 %v2217_v63, %v2201_v38 }
 0x434   :  { %v2219_v0 = vpop.eup %2218 }
 0x435   :  { %v1288_v1 = vmul.f32 %v2219_v0, %v2203_v40 }
 0x436   :  { %v2221_v3 = vpop.eup %2220 }
 0x437   :  { %2153 = vmatprep.mubr.msk.f32.mxu1 %vm1207_vm2, %v1288_v1  ;;  %v1291_v7 = vmul.f32 %v2221_v3, %v2205_v42 }
 0x438   :  { %v2223_v5 = vpop.eup %2222  ;;  %2154 = vmatmul.mubr.msk.f32.vlgmr.msra.gmra.mxu1 %vm1207_vm2, %v1289_v2 }
 0x439   :  { %v1290_v6 = vmul.f32 %v2223_v5, %v2207_v44  ;;  %2166 = vmatpush3.msra.mxu1 %v1426_v54 }
 0x43a   :  { %2167 = vmatprep.subr.mxu1 %v1425_v4  ;;  %v2225_v8 = vpop.eup %2224 }
 0x43b   :  { %2156 = vmatprep.mubr.msk.f32.mxu1 %vm1207_vm2, %v1290_v6  ;;  %2168 = vmatpush3.msra.mxu1 %v1425_v4  ;;  %v1293_v11 = vmul.f32 %v2225_v8, %v2209_v46 }
 0x43c   :  { %v2227_v9 = vpop.eup %2226  ;;  %2157 = vmatmul.mubr.msk.f32.gmra.mxu1 %vm1207_vm2, %v1291_v7  ;;  %2172 = vmatprep.subr.mxu1 %v1428_v16 }
 0x43d   :  { %v1292_v10 = vmul.f32 %v2227_v9, %v2211_v48 }
 0x43e   :  { %v2229_v12 = vpop.eup %2228 }
 0x43f   :  { %2159 = vmatprep.mubr.msk.f32.mxu1 %vm1207_vm2, %v1292_v10  ;;  %v1295_v15 = vmul.f32 %v2229_v12, %v2213_v50 }
 0x440   :  { %v2231_v13 = vpop.eup %2230  ;;  %2160 = vmatmul.mubr.msk.f32.gmra.mxu1 %vm1207_vm2, %v1293_v11 }
 0x441   :  { %v1294_v14 = vmul.f32 %v2231_v13, %v2215_v52 }
 0x443   :  { %2162 = vmatprep.mubr.msk.f32.mxu1 %vm1207_vm2, %v1294_v14 }
 0x444   :  { %2163 = vmatmul.mubr.msk.f32.gmra.mxu1 %vm1207_vm2, %v1295_v15 }
 0x4f8   :  { %v2155_v17 = vpop.f32.mrf.mxu1 }
 0x4fa   :  { %v1386_v18 = vpop.f32.mrf.mxu1 }
 0x4fb   :  { %2169 = vmatprep.mubr.msk.f32.mxu1 %vm1029_vm1, %v1386_v18 }
 0x4fc   :  { %v2158_v20 = vpop.f32.mrf.mxu1  ;;  %2170 = vmatmul.mubr.msk.f32.vlgmr.msra.gmra.mxu1 %vm1029_vm1, %v2155_v17 }
 0x4fd   :  { %2173 = vmatpush3.msra.mxu1 %v1428_v16 }
 0x4fe   :  { %2174 = vmatprep.subr.mxu1 %v1427_v19  ;;  %v1396_v22 = vpop.f32.mrf.mxu1 }
 0x4ff   :  { %2175 = vmatpush3.msra.mxu1 %v1427_v19  ;;  %2176 = vmatprep.mubr.msk.f32.mxu1 %vm1029_vm1, %v1396_v22 }
 0x500   :  { %2179 = vmatprep.subr.mxu1 %v1430_v21  ;;  %v2161_v24 = vpop.f32.mrf.mxu1  ;;  %2177 = vmatmul.mubr.msk.f32.vlgmr.msra.gmra.mxu1 %vm1029_vm1, %v2158_v20 }
 0x501   :  { %2180 = vmatpush3.msra.mxu1 %v1430_v21 }
 0x502   :  { %2181 = vmatprep.subr.mxu1 %v1429_v23  ;;  %v1406_v26 = vpop.f32.mrf.mxu1 }
 0x503   :  { %2182 = vmatpush3.msra.mxu1 %v1429_v23  ;;  %2183 = vmatprep.mubr.msk.f32.mxu1 %vm1029_vm1, %v1406_v26 }
 0x504   :  { %2186 = vmatprep.subr.mxu1 %v1432_v25  ;;  %v2164_v28 = vpop.f32.mrf.mxu1  ;;  %2184 = vmatmul.mubr.msk.f32.vlgmr.msra.gmra.mxu1 %vm1029_vm1, %v2161_v24 }
 0x505   :  { %2187 = vmatpush3.msra.mxu1 %v1432_v25 }
 0x506   :  { %2188 = vmatprep.subr.mxu1 %v1431_v27  ;;  %v1416_v29 = vpop.f32.mrf.mxu1 }
 0x507   :  { %2189 = vmatpush3.msra.mxu1 %v1431_v27  ;;  %2190 = vmatprep.mubr.msk.f32.mxu1 %vm1029_vm1, %v1416_v29 }
 0x508   :  { %2191 = vmatmul.mubr.msk.f32.vlgmr.msra.gmra.mxu1 %vm1029_vm1, %v2164_v28 }
 0x5bc   :  { %v2171_v30 = vpop.f32.mrf.mxu1 }
 0x5bd   :  { %v1764_v36 = vsel %vm29_vm0, %v2171_v30, 0.0 }
 0x5be   :  { %v1505_v31 = vpop.f32.mrf.mxu1 }
 0x5bf   :  { %v1757_v41 = vsel %vm29_vm0, %v1505_v31, 0.0 }
 0x5c0   :  { %v2178_v32 = vpop.f32.mrf.mxu1 }
 0x5c1   :  { %v1765_v34 = vsel %vm29_vm0, %v2178_v32, 0.0 }
 0x5c2   :  { %v1586_v33 = vpop.f32.mrf.mxu1  ;;  %v1766_v39 = vadd.f32 %v1765_v34, %v1764_v36 }
 0x5c3   :  { %v1758_v37 = vsel %vm29_vm0, %v1586_v33, 0.0 }
 0x5c4   :  { %v2185_v35 = vpop.f32.mrf.mxu1  ;;  %v1759_v43 = vadd.f32 %v1758_v37, %v1757_v41 }
 0x5c5   :  { %v1767_v38 = vsel %vm29_vm0, %v2185_v35, 0.0 }
 0x5c6   :  { %v1667_v40 = vpop.f32.mrf.mxu1  ;;  %v1768_v44 = vadd.f32 %v1767_v38, %v1766_v39 }
 0x5c7   :  { %v1760_v42 = vsel %vm29_vm0, %v1667_v40, 0.0 }
 0x5c8   :  { %v2192_v45 = vpop.f32.mrf.mxu1  ;;  %v1761_v48 = vadd.f32 %v1760_v42, %v1759_v43 }
 0x5c9   :  { %v1769_v46 = vsel %vm29_vm0, %v2192_v45, 0.0 }
 0x5ca   :  { %v1770_v49 = vadd.f32 %v1769_v46, %v1768_v44  ;;  %v1748_v50 = vpop.f32.mrf.mxu1 }
 0x5cb   :  { %v1762_v51 = vsel %vm29_vm0, %v1748_v50, 0.0 }
 0x5cc   :  { %v1779_v52 = vadd.f32 %v1856_v47, %v1770_v49  ;;  %v1763_v53 = vadd.f32 %v1762_v51, %v1761_v48 }
 0x5ce   :  { %1781 = vst.msk [vmem:[#allocation2 + $0x8] sm:$0xff] %vm29_vm0, %v1779_v52  ;;  %v1778_v54 = vadd.f32 %v1856_v47, %v1763_v53 }
 0x5d0   :  { %1780 = vst.msk [vmem:[#allocation2] sm:$0xff] %vm29_vm0, %v1778_v54 }
 0x5d1   :  { %2243 = shalt.err (!%p2240_p4)
}
 0x5d2   :  { %s2255_s5 = smov 128   ;;  %s2256_s30 = smov 8  }
 0x5d3   :  { %1793 = dma.vmem_to_hbm [thread:$0]  %s1788_s28, 256, %s2636_s7, [#allocation3], %s2255_s5, %s2255_s5, %s2256_s30  }
 0x5d4   :  { %2252 = dma.done.wait [#allocation3], 256  }
 0x5d5   :  { %2253 = vsyncadd [#allocation3], 4294967040 }
 0x5d6   :  { %1797 = vsyncpa [#allocation3], 1 }

</bundles_post_ra>
